<compile_context>
chip_gen: v6e
topology: v6e:2x2x1
jax: 0.10.0
libtpu: 0.0.40
codegen_flags: <defaults>
</compile_context>

<pallas_src>
import numpy as np
import jax
import jax.numpy as jnp
from jax.experimental import pallas as pl
from jax.experimental.pallas import tpu as pltpu


def _round_up(x, m):
    return ((x + m - 1) // m) * m


# ---------------------------------------------------------------------------
# Pallas kernel: one multi-head GAT layer (heads fused along fan_out)
# ---------------------------------------------------------------------------
def gat_layer_kernel(h_ref, xe_ref, S_ref,
                     wm_ref, bm_ref, wah_ref, wam_ref, ba_ref,
                     out_ref, acc_ref, zn_ref):
    """Grid = (node_tiles, edge_tiles); edge axis is the reduction axis.

    h_ref  : (tn, Din)    node features for this node tile
    xe_ref : (te, Din+Fe) [h_src ; efeat] for this edge tile
    S_ref  : (tn, te)     bf16 scatter matrix block, S[n,e]=1 iff dst[e]==n
    wm/bm  : fused W_msg^T   (Din+Fe, Dp), (1, Dp)
    wah    : fused W_apply^T node part     (Din, Dp)
    wam    : fused W_apply^T msg  part     (Dp, Dp)  block-diagonal per head
    out    : (tn, Dp)     lane-dense (Dp is a multiple of 128)
    acc    : (tn, Dp) f32 per-node message accumulator          (VMEM scratch)
    zn     : (tn, Dp) f32 node part of the apply (h@Wa_h + b_a) (VMEM scratch)
    """
    j = pl.program_id(1)

    @pl.when(j == 0)
    def _():
        acc_ref[...] = jnp.zeros_like(acc_ref)
        # Node part of the apply: independent of the edge reduction, so do it on
        # the first edge step to balance MXU work across the pipelined loop.
        zn_ref[...] = (jnp.dot(h_ref[...], wah_ref[...],
                               preferred_element_type=jnp.float32) + ba_ref[...])

    # Edge messages for this edge tile: relu(W_msg @ [h_src ; e])
    msg = jnp.dot(xe_ref[...], wm_ref[...],
                  preferred_element_type=jnp.float32) + bm_ref[...]
    msg = jnp.maximum(msg, 0.0)

    # Scatter-add onto destination nodes of this node tile (dense matmul on MXU).
    acc_ref[...] += jnp.dot(S_ref[...].astype(jnp.float32), msg,
                            preferred_element_type=jnp.float32)

    # Node update after the last edge tile: relu(h@Wa_h + aggr@Wa_m + b_a)
    @pl.when(j == pl.num_programs(1) - 1)
    def _():
        z = zn_ref[...] + jnp.dot(acc_ref[...], wam_ref[...],
                                  preferred_element_type=jnp.float32)
        out_ref[...] = jnp.maximum(z, 0.0)


# ---------------------------------------------------------------------------
# Pallas wrapper
# ---------------------------------------------------------------------------
def gat_layer_pallas(h, x_edge, S, fp, tn, te):
    """One fused multi-head GAT layer.  Returns (N_pad, Dp) with real output in
    columns [:, :H*d_out] and zeros / dead values in the lane padding."""
    N_pad, Din = h.shape
    E_pad, Dme = x_edge.shape
    Dp = fp["wm"].shape[1]
    grid = (N_pad // tn, E_pad // te)

    cost = pl.CostEstimate(
        flops=int(2 * grid[0] * E_pad * Dme * Dp        # edge messages (per node tile)
                  + 2 * N_pad * E_pad * Dp              # scatter-add matmul
                  + 2 * N_pad * (Din + Dp) * Dp),       # node update
        transcendentals=0,
        bytes_accessed=int(S.size * 2                   # bf16 scatter matrix
                           + grid[0] * x_edge.size * 4  # edge features per node tile
                           + h.size * 4
                           + N_pad * Dp * 4
                           + 4 * (fp["wm"].size + fp["wa_h"].size + fp["wa_m"].size)),
    )

    return pl.pallas_call(
        gat_layer_kernel,
        out_shape=jax.ShapeDtypeStruct((N_pad, Dp), jnp.float32),
        grid=grid,
        in_specs=[
            pl.BlockSpec((tn, Din), lambda i, j: (i, 0)),   # h        (node tile)
            pl.BlockSpec((te, Dme), lambda i, j: (j, 0)),   # [hsrc;e] (edge tile)
            pl.BlockSpec((tn, te), lambda i, j: (i, j)),    # S        (node x edge tile)
            pl.BlockSpec((Dme, Dp), lambda i, j: (0, 0)),   # W_msg   (resident)
            pl.BlockSpec((1, Dp), lambda i, j: (0, 0)),     # b_msg
            pl.BlockSpec((Din, Dp), lambda i, j: (0, 0)),   # W_apply node part
            pl.BlockSpec((Dp, Dp), lambda i, j: (0, 0)),    # W_apply msg part (block-diag)
            pl.BlockSpec((1, Dp), lambda i, j: (0, 0)),     # b_apply
        ],
        out_specs=pl.BlockSpec((tn, Dp), lambda i, j: (i, 0)),
        scratch_shapes=[pltpu.VMEM((tn, Dp), jnp.float32),   # message accumulator
                        pltpu.VMEM((tn, Dp), jnp.float32)],  # node-part of apply
        compiler_params=pltpu.CompilerParams(
            dimension_semantics=("parallel", "arbitrary"),
            vmem_limit_bytes=48 * 1024 * 1024,
        ),
        cost_estimate=cost,
    )(h, x_edge, S, fp["wm"], fp["bm"], fp["wa_h"], fp["wa_m"], fp["ba"])


# ---------------------------------------------------------------------------
# Parameter construction (mirrors nn.Linear shapes, xavier_normal gain='relu',
# PyTorch default uniform bias init)
# ---------------------------------------------------------------------------
def _xavier_normal(key, fan_in, fan_out, gain):
    std = gain * np.sqrt(2.0 / (fan_in + fan_out))
    return (jax.random.normal(key, (fan_in, fan_out), jnp.float32) * std).astype(jnp.float32)


def _linear_bias(key, fan_in, fan_out):
    bound = 1.0 / np.sqrt(fan_in)
    return jax.random.uniform(key, (1, fan_out), jnp.float32, -bound, bound)


def make_gatlayer_params(key, in_dim, out_dim, efeats):
    k1, k2, k3, k4 = jax.random.split(key, 4)
    gain = float(np.sqrt(2.0))  # nn.init.calculate_gain('relu')
    wm = _xavier_normal(k1, in_dim + efeats, out_dim, gain)   # W_msg^T   : (in+ef, out)
    wa = _xavier_normal(k2, in_dim + out_dim, out_dim, gain)  # W_apply^T : (in+out, out)
    return dict(
        wm=wm,
        bm=_linear_bias(k3, in_dim + efeats, out_dim),
        wa_h=wa[:in_dim], wa_m=wa[in_dim:],
        ba=_linear_bias(k4, in_dim + out_dim, out_dim),
    )


def fuse_heads(heads):
    """Pack H per-head parameter sets into one lane-dense weight set.

    Head h occupies output columns [h*d_out, (h+1)*d_out); total fan_out padded to a
    multiple of 128 so stores and MXU N-dims are lane-dense.  W_apply's msg part is
    block-diagonal so each head only sees its own aggregated messages."""
    H = len(heads)
    d_out = heads[0]["wm"].shape[1]
    dme = heads[0]["wm"].shape[0]
    din = heads[0]["wa_h"].shape[0]
    Dp = max(128, _round_up(H * d_out, 128))

    wm = jnp.zeros((dme, Dp), jnp.float32)
    wa_h = jnp.zeros((din, Dp), jnp.float32)
    wa_m = jnp.zeros((Dp, Dp), jnp.float32)
    bm = jnp.zeros((1, Dp), jnp.float32)
    ba = jnp.zeros((1, Dp), jnp.float32)
    for hidx, p in enumerate(heads):
        c0 = hidx * d_out
        wm = wm.at[:, c0:c0 + d_out].set(p["wm"])
        wa_h = wa_h.at[:, c0:c0 + d_out].set(p["wa_h"])
        wa_m = wa_m.at[c0:c0 + d_out, c0:c0 + d_out].set(p["wa_m"])
        bm = bm.at[:, c0:c0 + d_out].set(p["bm"])
        ba = ba.at[:, c0:c0 + d_out].set(p["ba"])
    return dict(wm=wm, bm=bm, wa_h=wa_h, wa_m=wa_m, ba=ba, H=H, d_out=d_out, Dp=Dp)


def make_gat_params(key, in_dim, hidden_dim, out_dim, num_heads, efeats, num_layers):
    layer_cfgs = [(in_dim, hidden_dim, num_heads)]
    hd = hidden_dim
    hd_out = None
    for _ in range(num_layers):
        hd_in = hd
        hd_out = int(hd_in * 0.5)
        layer_cfgs.append((hd_in * num_heads, hd_out, num_heads))
        hd = hd_out
    layer_cfgs.append((hd_out * num_heads, out_dim, 1))

    params = []
    for (din, dout, heads) in layer_cfgs:
        heads_p = []
        for _ in range(heads):
            key, sub = jax.random.split(key)
            heads_p.append(make_gatlayer_params(sub, din, dout, efeats))
        params.append(heads_p)
    return params


# ---------------------------------------------------------------------------
# Full GAT forward (Pallas hot path; JAX glue for gather / padding / final score)
# ---------------------------------------------------------------------------
def gat_forward(params, node_feats, edge_feats, src, dst, num_nodes):
    N = num_nodes
    E = src.shape[0]

    # Tile sizes: node axis multiple of 8 (sublane), edge axis multiple of 128 (lane).
    tn = min(256, _round_up(N, 8))
    te = min(1024, _round_up(E, 128))
    N_pad = _round_up(N, tn)
    E_pad = _round_up(E, te)

    # Dense scatter matrix (bf16, exact 0/1): S[n, e] = 1 iff dst[e] == n.
    # Padded edge columns / padded node rows stay zero, so padding never contributes.
    S = jnp.zeros((N_pad, E_pad), jnp.bfloat16).at[dst, jnp.arange(E)].set(1.0)

    h = jnp.pad(node_feats.astype(jnp.float32), ((0, N_pad - N), (0, 0)))
    ef = jnp.pad(edge_feats.astype(jnp.float32), ((0, E_pad - E), (0, 0)))

    for heads in params:
        fused = fuse_heads(heads)
        hsrc = jnp.take(h, src, axis=0)                      # (E, Din), src < N
        hsrc = jnp.pad(hsrc, ((0, E_pad - E), (0, 0)))
        x_edge = jnp.concatenate([hsrc, ef], axis=1)         # [h_src ; efeat]
        out = gat_layer_pallas(h, x_edge, S, fused, tn, te)  # (N_pad, Dp)
        h = out[:, :fused["H"] * fused["d_out"]]             # merge='cat', drop lane pad

    h = h[:N]
    # fn.u_dot_v('h','h','score'): trivially gather/bandwidth-bound -> plain JAX.
    return jnp.sum(h[src] * h[dst], axis=1)                  # (E,)


def gat_forward_ref(params, node_feats, edge_feats, src, dst, num_nodes):
    h = node_feats
    for heads in params:
        head_outs = []
        for p in heads:
            xe = jnp.concatenate([h[src], edge_feats], axis=1)
            msg = jnp.maximum(xe @ p["wm"] + p["bm"], 0.0)
            agg = jnp.zeros((num_nodes, msg.shape[1]), jnp.float32).at[dst].add(msg)
            z = jnp.maximum(h @ p["wa_h"] + agg @ p["wa_m"] + p["ba"], 0.0)
            head_outs.append(z)
        h = jnp.concatenate(head_outs, axis=1)
    return jnp.sum(h[src] * h[dst], axis=1)


if __name__ == "__main__":
    key = jax.random.PRNGKey(0)
    N, E = 16, 32
    in_dim, hidden_dim, out_dim = 8, 8, 4
    num_heads, efeats_dim, num_layers = 2, 4, 1

    k1, k2, k3, k4, kp = jax.random.split(key, 5)
    node_feats = jax.random.normal(k1, (N, in_dim), jnp.float32)
    edge_feats = jax.random.normal(k2, (E, efeats_dim), jnp.float32)
    src = jax.random.randint(k3, (E,), 0, N)
    dst = jax.random.randint(k4, (E,), 0, N)

    params = make_gat_params(kp, in_dim, hidden_dim, out_dim,
                             num_heads, efeats_dim, num_layers)

    score = gat_forward(params, node_feats, edge_feats, src, dst, N)
    score = jax.block_until_ready(score)

    ref = gat_forward_ref(params, node_feats, edge_feats, src, dst, N)
    assert score.shape == (E,)
    np.testing.assert_allclose(np.asarray(score), np.asarray(ref), rtol=1e-4, atol=1e-4)

    print("KERNEL_OK")
</pallas_src>

<mosaic_0001>
module attributes {stable_mosaic.version = 11 : i64} {
  func.func @gat_layer_kernel(%arg0: i32, %arg1: i32, %arg2: memref<16x8xf32, #tpu.memory_space<vmem>>, %arg3: memref<128x12xf32, #tpu.memory_space<vmem>>, %arg4: memref<16x128xbf16, #tpu.memory_space<vmem>>, %arg5: memref<12x128xf32, #tpu.memory_space<vmem>>, %arg6: memref<1x128xf32, #tpu.memory_space<vmem>>, %arg7: memref<8x128xf32, #tpu.memory_space<vmem>>, %arg8: memref<128x128xf32, #tpu.memory_space<vmem>>, %arg9: memref<1x128xf32, #tpu.memory_space<vmem>>, %arg10: memref<16x128xf32, #tpu.memory_space<vmem>>, %arg11: memref<16x128xf32, #tpu.memory_space<vmem>>, %arg12: memref<16x128xf32, #tpu.memory_space<vmem>>) attributes {dimension_semantics = [#tpu.dimension_semantics<parallel>, #tpu.dimension_semantics<arbitrary>], iteration_bounds = array<i64: 1, 1>, scalar_prefetch = 0 : i64, scratch_operands = 2 : i64, tpu.core_type = #tpu.core_type<tc>, window_params = [{transform_indices = @transform_0, window_bounds = array<i64: 16, 8>}, {transform_indices = @transform_1, window_bounds = array<i64: 128, 12>}, {transform_indices = @transform_2, window_bounds = array<i64: 16, 128>}, {pipeline_mode = #tpu.pipeline_mode<synchronous>, transform_indices = @transform_3, window_bounds = array<i64: 12, 128>}, {pipeline_mode = #tpu.pipeline_mode<synchronous>, transform_indices = @transform_4, window_bounds = array<i64: 1, 128>}, {pipeline_mode = #tpu.pipeline_mode<synchronous>, transform_indices = @transform_5, window_bounds = array<i64: 8, 128>}, {pipeline_mode = #tpu.pipeline_mode<synchronous>, transform_indices = @transform_6, window_bounds = array<i64: 128, 128>}, {pipeline_mode = #tpu.pipeline_mode<synchronous>, transform_indices = @transform_7, window_bounds = array<i64: 1, 128>}, {transform_indices = @transform_8, window_bounds = array<i64: 16, 128>}]} {
    %c0_i32 = arith.constant 0 : i32
    %0 = arith.cmpi eq, %arg1, %c0_i32 : i32
    %1 = arith.extui %0 : i1 to i32
    %c0_i32_0 = arith.constant 0 : i32
    %2 = arith.cmpi ne, %1, %c0_i32_0 : i32
    scf.if %2 {
      %cst_16 = arith.constant 0.000000e+00 : f32
      %20 = vector.broadcast %cst_16 : f32 to vector<16x128xf32>
      %c0_17 = arith.constant 0 : index
      %c0_18 = arith.constant 0 : index
      %21 = vector.load %arg11[%c0_17, %c0_18] : memref<16x128xf32, #tpu.memory_space<vmem>>, vector<16x128xf32>
      tpu.vector_store %arg11[%c0_17, %c0_18], %20 {strides = array<i32>} : memref<16x128xf32, #tpu.memory_space<vmem>>, vector<16x128xf32>,
      %c0_19 = arith.constant 0 : index
      %c0_20 = arith.constant 0 : index
      %22 = vector.load %arg2[%c0_19, %c0_20] : memref<16x8xf32, #tpu.memory_space<vmem>>, vector<16x8xf32>
      %c0_21 = arith.constant 0 : index
      %c0_22 = arith.constant 0 : index
      %23 = vector.load %arg7[%c0_21, %c0_22] : memref<8x128xf32, #tpu.memory_space<vmem>>, vector<8x128xf32>
      %cst_23 = arith.constant dense<0.000000e+00> : vector<16x128xf32>
      %24 = tpu.matmul %22, %23, %cst_23 {dimension_numbers = #tpu.dot_dimension_numbers<[1], [0], [0], [1], [0, 0, 1, 1], [], []>} : vector<16x8xf32>, vector<8x128xf32>, vector<16x128xf32> -> vector<16x128xf32>
      %c0_24 = arith.constant 0 : index
      %c0_25 = arith.constant 0 : index
      %25 = vector.load %arg9[%c0_24, %c0_25] : memref<1x128xf32, #tpu.memory_space<vmem>>, vector<1x128xf32>
      %26 = vector.broadcast %25 : vector<1x128xf32> to vector<16x128xf32>
      %27 = arith.addf %24, %26 : vector<16x128xf32>
      %c0_26 = arith.constant 0 : index
      %c0_27 = arith.constant 0 : index
      %28 = vector.load %arg12[%c0_26, %c0_27] : memref<16x128xf32, #tpu.memory_space<vmem>>, vector<16x128xf32>
      tpu.vector_store %arg12[%c0_26, %c0_27], %27 {strides = array<i32>} : memref<16x128xf32, #tpu.memory_space<vmem>>, vector<16x128xf32>,
    } else {
    }
    %c0 = arith.constant 0 : index
    %c0_1 = arith.constant 0 : index
    %3 = vector.load %arg3[%c0, %c0_1] : memref<128x12xf32, #tpu.memory_space<vmem>>, vector<128x12xf32>
    %c0_2 = arith.constant 0 : index
    %c0_3 = arith.constant 0 : index
    %4 = vector.load %arg5[%c0_2, %c0_3] : memref<12x128xf32, #tpu.memory_space<vmem>>, vector<12x128xf32>
    %cst = arith.constant dense<0.000000e+00> : vector<128x128xf32>
    %5 = tpu.matmul %3, %4, %cst {dimension_numbers = #tpu.dot_dimension_numbers<[1], [0], [0], [1], [0, 0, 1, 1], [], []>} : vector<128x12xf32>, vector<12x128xf32>, vector<128x128xf32> -> vector<128x128xf32>
    %c0_4 = arith.constant 0 : index
    %c0_5 = arith.constant 0 : index
    %6 = vector.load %arg6[%c0_4, %c0_5] : memref<1x128xf32, #tpu.memory_space<vmem>>, vector<1x128xf32>
    %7 = vector.broadcast %6 : vector<1x128xf32> to vector<128x128xf32>
    %8 = arith.addf %5, %7 : vector<128x128xf32>
    %cst_6 = arith.constant 0.000000e+00 : f32
    %9 = vector.broadcast %cst_6 : f32 to vector<128x128xf32>
    %10 = arith.maximumf %8, %9 : vector<128x128xf32>
    %c0_7 = arith.constant 0 : index
    %c0_8 = arith.constant 0 : index
    %11 = vector.load %arg11[%c0_7, %c0_8] : memref<16x128xf32, #tpu.memory_space<vmem>>, vector<16x128xf32>
    %c0_9 = arith.constant 0 : index
    %c0_10 = arith.constant 0 : index
    %12 = vector.load %arg4[%c0_9, %c0_10] : memref<16x128xbf16, #tpu.memory_space<vmem>>, vector<16x128xbf16>
    %13 = arith.extf %12 : vector<16x128xbf16> to vector<16x128xf32>
    %cst_11 = arith.constant dense<0.000000e+00> : vector<16x128xf32>
    %14 = tpu.matmul %13, %10, %cst_11 {dimension_numbers = #tpu.dot_dimension_numbers<[1], [0], [0], [1], [0, 0, 1, 1], [], []>} : vector<16x128xf32>, vector<128x128xf32>, vector<16x128xf32> -> vector<16x128xf32>
    %15 = arith.addf %11, %14 : vector<16x128xf32>
    %c0_12 = arith.constant 0 : index
    %c0_13 = arith.constant 0 : index
    %16 = vector.load %arg11[%c0_12, %c0_13] : memref<16x128xf32, #tpu.memory_space<vmem>>, vector<16x128xf32>
    tpu.vector_store %arg11[%c0_12, %c0_13], %15 {strides = array<i32>} : memref<16x128xf32, #tpu.memory_space<vmem>>, vector<16x128xf32>,
    %c0_i32_14 = arith.constant 0 : i32
    %17 = arith.cmpi eq, %arg1, %c0_i32_14 : i32
    %18 = arith.extui %17 : i1 to i32
    %c0_i32_15 = arith.constant 0 : i32
    %19 = arith.cmpi ne, %18, %c0_i32_15 : i32
    scf.if %19 {
      %c0_16 = arith.constant 0 : index
      %c0_17 = arith.constant 0 : index
      %20 = vector.load %arg12[%c0_16, %c0_17] : memref<16x128xf32, #tpu.memory_space<vmem>>, vector<16x128xf32>
      %c0_18 = arith.constant 0 : index
      %c0_19 = arith.constant 0 : index
      %21 = vector.load %arg11[%c0_18, %c0_19] : memref<16x128xf32, #tpu.memory_space<vmem>>, vector<16x128xf32>
      %c0_20 = arith.constant 0 : index
      %c0_21 = arith.constant 0 : index
      %22 = vector.load %arg8[%c0_20, %c0_21] : memref<128x128xf32, #tpu.memory_space<vmem>>, vector<128x128xf32>
      %cst_22 = arith.constant dense<0.000000e+00> : vector<16x128xf32>
      %23 = tpu.matmul %21, %22, %cst_22 {dimension_numbers = #tpu.dot_dimension_numbers<[1], [0], [0], [1], [0, 0, 1, 1], [], []>} : vector<16x128xf32>, vector<128x128xf32>, vector<16x128xf32> -> vector<16x128xf32>
      %24 = arith.addf %20, %23 : vector<16x128xf32>
      %cst_23 = arith.constant 0.000000e+00 : f32
      %25 = vector.broadcast %cst_23 : f32 to vector<16x128xf32>
      %26 = arith.maximumf %24, %25 : vector<16x128xf32>
      %c0_24 = arith.constant 0 : index
      %c0_25 = arith.constant 0 : index
      %27 = vector.load %arg10[%c0_24, %c0_25] : memref<16x128xf32, #tpu.memory_space<vmem>>, vector<16x128xf32>
      tpu.vector_store %arg10[%c0_24, %c0_25], %26 {strides = array<i32>} : memref<16x128xf32, #tpu.memory_space<vmem>>, vector<16x128xf32>,
    } else {
    }
    return
  }
  func.func @transform_0(%arg0: i32, %arg1: i32) -> (i32, i32) {
    %c0_i32 = arith.constant 0 : i32
    %c0_i32_0 = arith.constant 0 : i32
    return %arg0, %c0_i32 : i32, i32
  }
  func.func @transform_1(%arg0: i32, %arg1: i32) -> (i32, i32) {
    %c0_i32 = arith.constant 0 : i32
    %c0_i32_0 = arith.constant 0 : i32
    return %arg1, %c0_i32 : i32, i32
  }
  func.func @transform_2(%arg0: i32, %arg1: i32) -> (i32, i32) {
    %c0_i32 = arith.constant 0 : i32
    return %arg0, %arg1 : i32, i32
  }
  func.func @transform_3(%arg0: i32, %arg1: i32) -> (i32, i32) {
    %c0_i32 = arith.constant 0 : i32
    %c0_i32_0 = arith.constant 0 : i32
    %c0_i32_1 = arith.constant 0 : i32
    return %c0_i32, %c0_i32_0 : i32, i32
  }
  func.func @transform_4(%arg0: i32, %arg1: i32) -> (i32, i32) {
    %c0_i32 = arith.constant 0 : i32
    %c0_i32_0 = arith.constant 0 : i32
    %c0_i32_1 = arith.constant 0 : i32
    return %c0_i32, %c0_i32_0 : i32, i32
  }
  func.func @transform_5(%arg0: i32, %arg1: i32) -> (i32, i32) {
    %c0_i32 = arith.constant 0 : i32
    %c0_i32_0 = arith.constant 0 : i32
    %c0_i32_1 = arith.constant 0 : i32
    return %c0_i32, %c0_i32_0 : i32, i32
  }
  func.func @transform_6(%arg0: i32, %arg1: i32) -> (i32, i32) {
    %c0_i32 = arith.constant 0 : i32
    %c0_i32_0 = arith.constant 0 : i32
    %c0_i32_1 = arith.constant 0 : i32
    return %c0_i32, %c0_i32_0 : i32, i32
  }
  func.func @transform_7(%arg0: i32, %arg1: i32) -> (i32, i32) {
    %c0_i32 = arith.constant 0 : i32
    %c0_i32_0 = arith.constant 0 : i32
    %c0_i32_1 = arith.constant 0 : i32
    return %c0_i32, %c0_i32_0 : i32, i32
  }
  func.func @transform_8(%arg0: i32, %arg1: i32) -> (i32, i32) {
    %c0_i32 = arith.constant 0 : i32
    %c0_i32_0 = arith.constant 0 : i32
    return %arg0, %c0_i32 : i32, i32
  }
}

</mosaic_0001>

<bundles_post_ra>
// kernel: tpu_custom_call.1
= control target key start
LH: loop header
LB: loop body
LE: loop exit
PB: predicated region body
PF: predicated region fallthrough
CT: control target
= control target key end

     0   :  { %vm204_vm0 = vcmask 1043456   ;;  %vm155_vm1 = vcmask 97280   ;;  %s981_s0 = inlined_call_operand.vmem [shape: f32[16,8], index: 0, kind: input, shape index: {}]   ;;  %s982_s1 = inlined_call_operand.vmem [shape: f32[128,12], index: 1, kind: input, shape index: {}]   ;;  %s983_s2 = inlined_call_operand.vmem [shape: bf16[16,128], index: 2, kind: input, shape index: {}]   ;;  %s984_s3 = inlined_call_operand.vmem [shape: f32[12,128], index: 3, kind: input, shape index: {}]   ;;  %s985_s4 = inlined_call_operand.vmem [shape: f32[1,128], index: 4, kind: input, shape index: {}]   ;;  %s986_s5 = inlined_call_operand.vmem [shape: f32[8,128], index: 5, kind: input, shape index: {}]   ;;  %s987_s6 = inlined_call_operand.vmem [shape: f32[128,128], index: 6, kind: input, shape index: {}]   ;;  %s988_s7 = inlined_call_operand.vmem [shape: f32[1,128], index: 7, kind: input, shape index: {}]   ;;  %s989_s8 = inlined_call_operand.hbm [shape: f32[16,128], index: 8, kind: output, shape index: {}]  }
   0x1   :  { %v147_v0 = vld [vmem:[%s984_s3 + $0x8] sm:$0xf]  ;;  %v146_v1 = vld [vmem:[%s984_s3] sm:$0xff]  ;;  %v132_v4 = vld [vmem:[%s982_s1 + $0x10] sm:$0xff] }
   0x2   :  { %v130_v2 = vld [vmem:[%s982_s1] sm:$0xff]  ;;  %661 = vmatprep.subr.msk.mxu1 %vm204_vm0, %v147_v0  ;;  %v131_v3 = vld [vmem:[%s982_s1 + $0x8] sm:$0xff]  ;;  %v133_v5 = vld [vmem:[%s982_s1 + $0x18] sm:$0xff] }
   0x3   :  { %665 = vmatprep.mubr.msk.f32.mxu1 %vm155_vm1, %v130_v2  ;;  %662 = vmatpush3.msk.msra.mxu1 %vm204_vm0, %v147_v0 }
   0x4   :  { %663 = vmatprep.subr.mxu1 %v146_v1 }
   0x5   :  { %664 = vmatpush3.msra.mxu1 %v146_v1 }
   0x6   :  { %666 = vmatmul.mubr.msk.f32.vlgmr.msra.gmra.mxu1 %vm155_vm1, %v131_v3 }
   0x7   :  { %668 = vmatprep.mubr.msk.f32.mxu1 %vm155_vm1, %v132_v4 }
   0x8   :  { %13 = vsyncpa [#allocation5], 0  ;;  %v134_v6 = vld [vmem:[%s982_s1 + $0x20] sm:$0xff]  ;;  %v135_v7 = vld [vmem:[%s982_s1 + $0x28] sm:$0xff]  ;;  %vm46_vm2 = vcmask 64512   ;;  %s784_s29 = smov [#allocation4]  }
   0x9   :  { %v136_v8 = vld [vmem:[%s982_s1 + $0x30] sm:$0xff]  ;;  %v137_v9 = vld [vmem:[%s982_s1 + $0x38] sm:$0xff]  ;;  %v138_v10 = vld [vmem:[%s982_s1 + $0x40] sm:$0xff]  ;;  %s563_s30 = sshll.u32 %s784_s29, 4  ;;  %s564_s30 = int_to_ptr.vmem [resolvable:$true] %s563_s30 }
   0xa   :  { %669 = vmatmul.mubr.msk.f32.gmra.mxu1 %vm155_vm1, %v133_v5  ;;  %v139_v11 = vld [vmem:[%s982_s1 + $0x48] sm:$0xff]  ;;  %v140_v12 = vld [vmem:[%s982_s1 + $0x50] sm:$0xff]  ;;  %v141_v13 = vld [vmem:[%s982_s1 + $0x58] sm:$0xff]  ;;  %p767_p1 = scmp.lt.s32.totalorder %s564_s30, %s564_s30 }
   0xb   :  { %671 = vmatprep.mubr.msk.f32.mxu1 %vm155_vm1, %v134_v6  ;;  %v142_v14 = vld [vmem:[%s982_s1 + $0x60] sm:$0xff]  ;;  %v143_v15 = vld [vmem:[%s982_s1 + $0x68] sm:$0xff]  ;;  %v144_v16 = vld [vmem:[%s982_s1 + $0x70] sm:$0xff] }
   0xc   :  { %v145_v17 = vld [vmem:[%s982_s1 + $0x78] sm:$0xff]  ;;  %v38_v18 = vld [vmem:[%s986_s5] sm:$0xff]  ;;  %v37_v20 = vld [vmem:[%s981_s0 + $0x8] sm:$0xff] }
   0xd   :  { %656 = vmatprep.subr.mxu0 %v38_v18  ;;  %v36_v19 = vld [vmem:[%s981_s0] sm:$0xff]  ;;  %v476_v23 = vld [vmem:[%s987_s6 + $0x78] sm:$0xff]  ;;  %v475_v24 = vld [vmem:[%s987_s6 + $0x70] sm:$0xff] }
   0xe   :  { %672 = vmatmul.mubr.msk.f32.gmra.mxu1 %vm155_vm1, %v135_v7  ;;  %657 = vmatpush3.msra.mxu0 %v38_v18  ;;  %v914_v21 = vld [vmem:[%s983_s2] sm:$0xff]   ;;  %v474_v25 = vld [vmem:[%s987_s6 + $0x68] sm:$0xff]  ;;  %v472_v27 = vld [vmem:[%s987_s6 + $0x58] sm:$0xff] }
   0xf   :  { %674 = vmatprep.mubr.msk.f32.mxu1 %vm155_vm1, %v136_v8  ;;  %658 = vmatprep.mubr.msk.f32.mxu0 %vm46_vm2, %v36_v19  ;;  %v597_v22 = vunpack.c.l.bf16 %v914_v21  ;;  %v473_v26 = vld [vmem:[%s987_s6 + $0x60] sm:$0xff]  ;;  %v471_v28 = vld [vmem:[%s987_s6 + $0x50] sm:$0xff]  ;;  %v470_v29 = vld [vmem:[%s987_s6 + $0x48] sm:$0xff] }
  0x10   :  { %659 = vmatmul.mubr.msk.f32.vlgmr.msra.gmra.mxu0 %vm46_vm2, %v37_v20  ;;  %724 = vmatprep.subr.mxu1 %v476_v23  ;;  %v469_v30 = vld [vmem:[%s987_s6 + $0x40] sm:$0xff]  ;;  %v468_v31 = vld [vmem:[%s987_s6 + $0x38] sm:$0xff]  ;;  %v467_v32 = vld [vmem:[%s987_s6 + $0x30] sm:$0xff] }
  0x11   :  { %721 = vmatprep.mubr.f32.mxu0 %v597_v22  ;;  %725 = vmatpush3.msra.mxu1 %v476_v23  ;;  %v466_v33 = vld [vmem:[%s987_s6 + $0x28] sm:$0xff]  ;;  %v465_v34 = vld [vmem:[%s987_s6 + $0x20] sm:$0xff]  ;;  %v464_v35 = vld [vmem:[%s987_s6 + $0x18] sm:$0xff] }
  0x12   :  { %675 = vmatmul.mubr.msk.f32.gmra.mxu1 %vm155_vm1, %v137_v9  ;;  %726 = vmatprep.subr.mxu1 %v475_v24  ;;  %v463_v36 = vld [vmem:[%s987_s6 + $0x10] sm:$0xff]  ;;  %v462_v37 = vld [vmem:[%s987_s6 + $0x8] sm:$0xff]  ;;  %v577_v52 = vld [vmem:[%s985_s4] ss:$0 sm:$0xff] }
  0x13   :  { %677 = vmatprep.mubr.msk.f32.mxu1 %vm155_vm1, %v138_v10  ;;  %727 = vmatpush3.msra.mxu1 %v475_v24  ;;  %v598_v24 = vunpack.c.h.bf16 %v914_v21  ;;  %v574_v21 = vld [vmem:[%s988_s7] ss:$0 sm:$0xff] }
  0x14   :  { %728 = vmatprep.subr.mxu1 %v474_v25 }
  0x15   :  { %729 = vmatpush3.msra.mxu1 %v474_v25  ;;  %v461_v25 = vld [vmem:[%s987_s6] sm:$0xff]  ;;  %s762_s6 = scalar_lea.vmem %s564_s30, 256 }
  0x16   :  { %678 = vmatmul.mubr.msk.f32.gmra.mxu1 %vm155_vm1, %v139_v11  ;;  %730 = vmatprep.subr.mxu1 %v473_v26  ;;  %p763_p0 = scmp.ne.s32.totalorder %s564_s30, %s762_s6  ;;  %p768_p2 = scmp.lt.s32.totalorder %s762_s6, %s762_s6 }
  0x17   :  { %680 = vmatprep.mubr.msk.f32.mxu1 %vm155_vm1, %v140_v12  ;;  %731 = vmatpush3.msra.mxu1 %v473_v26 }
  0x18   :  { %732 = vmatprep.subr.mxu1 %v472_v27  ;;  %p769_p3 = por %p768_p2, %p767_p1 }
  0x19   :  { %733 = vmatpush3.msra.mxu1 %v472_v27 }
  0x1a   :  { %681 = vmatmul.mubr.msk.f32.gmra.mxu1 %vm155_vm1, %v141_v13  ;;  %734 = vmatprep.subr.mxu1 %v471_v28  ;;  %p770_p4 = pnand %p769_p3, %p763_p0 }
  0x1b   :  { %683 = vmatprep.mubr.msk.f32.mxu1 %vm155_vm1, %v142_v14  ;;  %735 = vmatpush3.msra.mxu1 %v471_v28 }
  0x1c   :  { %736 = vmatprep.subr.mxu1 %v470_v29 }
  0x1d   :  { %737 = vmatpush3.msra.mxu1 %v470_v29 }
  0x1e   :  { %684 = vmatmul.mubr.msk.f32.gmra.mxu1 %vm155_vm1, %v143_v15  ;;  %738 = vmatprep.subr.mxu1 %v469_v30 }
  0x1f   :  { %686 = vmatprep.mubr.msk.f32.mxu1 %vm155_vm1, %v144_v16  ;;  %739 = vmatpush3.msra.mxu1 %v469_v30 }
  0x20   :  { %740 = vmatprep.subr.mxu1 %v468_v31 }
  0x21   :  { %741 = vmatpush3.msra.mxu1 %v468_v31 }
  0x22   :  { %687 = vmatmul.mubr.msk.f32.gmra.mxu1 %vm155_vm1, %v145_v17  ;;  %742 = vmatprep.subr.mxu1 %v467_v32 }
  0x23   :  { %743 = vmatpush3.msra.mxu1 %v467_v32 }
  0x24   :  { %744 = vmatprep.subr.mxu1 %v466_v33 }
  0x25   :  { %745 = vmatpush3.msra.mxu1 %v466_v33 }
  0x26   :  { %746 = vmatprep.subr.mxu1 %v465_v34 }
  0x27   :  { %747 = vmatpush3.msra.mxu1 %v465_v34 }
  0x28   :  { %748 = vmatprep.subr.mxu1 %v464_v35 }
  0x29   :  { %749 = vmatpush3.msra.mxu1 %v464_v35 }
  0x2a   :  { %750 = vmatprep.subr.mxu1 %v463_v36 }
  0x2b   :  { %751 = vmatpush3.msra.mxu1 %v463_v36 }
  0x2c   :  { %752 = vmatprep.subr.mxu1 %v462_v37 }
  0x2d   :  { %753 = vmatpush3.msra.mxu1 %v462_v37 }
  0x2e   :  { %754 = vmatprep.subr.mxu1 %v461_v25 }
  0x2f   :  { %755 = vmatpush3.msra.mxu1 %v461_v25 }
  0xc6   :  { %v962_v38 = vpop.f32.mrf.mxu1 }
  0xc7   :  { %v280_v17 = vadd.f32 %v962_v38, %v577_v52 }
  0xc8   :  { %v964_v39 = vpop.f32.mrf.mxu1 }
  0xc9   :  { %v275_v19 = vadd.f32 %v577_v52, %v964_v39  ;;  %v354_v22 = vmax.f32 %v280_v17, 0.0 }
  0xca   :  { %v670_v40 = vpop.f32.mrf.mxu1 }
  0xcb   :  { %v290_v13 = vadd.f32 %v670_v40, %v577_v52  ;;  %v353_v23 = vmax.f32 %v275_v19, 0.0 }
  0xcc   :  { %v284_v41 = vpop.f32.mrf.mxu1 }
  0xcd   :  { %v285_v15 = vadd.f32 %v577_v52, %v284_v41  ;;  %v356_v18 = vmax.f32 %v290_v13, 0.0 }
  0xce   :  { %v673_v42 = vpop.f32.mrf.mxu1 }
  0xcf   :  { %v300_v9 = vadd.f32 %v673_v42, %v577_v52  ;;  %v355_v20 = vmax.f32 %v285_v15, 0.0 }
  0xd0   :  { %v294_v43 = vpop.f32.mrf.mxu1  ;;  %v660_v26 = vpop.f32.mrf.mxu0 }
  0xd1   :  { %v295_v11 = vadd.f32 %v577_v52, %v294_v43  ;;  %v358_v14 = vmax.f32 %v300_v9, 0.0  ;;  %v125_v30 = vadd.f32 %v660_v26, %v574_v21 }
  0xd2   :  { %v676_v44 = vpop.f32.mrf.mxu1  ;;  %v119_v27 = vpop.f32.mrf.mxu0 }
  0xd3   :  { %v310_v5 = vadd.f32 %v676_v44, %v577_v52  ;;  %v357_v16 = vmax.f32 %v295_v11, 0.0  ;;  %v120_v32 = vadd.f32 %v574_v21, %v119_v27 }
  0xd4   :  { %v304_v45 = vpop.f32.mrf.mxu1 }
  0xd5   :  { %v305_v7 = vadd.f32 %v577_v52, %v304_v45  ;;  %v360_v10 = vmax.f32 %v310_v5, 0.0 }
  0xd6   :  { %v679_v46 = vpop.f32.mrf.mxu1 }
  0xd7   :  { %v320_v1 = vadd.f32 %v679_v46, %v577_v52  ;;  %v359_v12 = vmax.f32 %v305_v7, 0.0 }
  0xd8   :  { %v314_v47 = vpop.f32.mrf.mxu1 }
  0xd9   :  { %v315_v3 = vadd.f32 %v577_v52, %v314_v47  ;;  %v362_v6 = vmax.f32 %v320_v1, 0.0 }
  0xda   :  { %v682_v48 = vpop.f32.mrf.mxu1 }
  0xdb   :  { %v330_v61 = vadd.f32 %v682_v48, %v577_v52  ;;  %v361_v8 = vmax.f32 %v315_v3, 0.0 }
  0xdc   :  { %v324_v49 = vpop.f32.mrf.mxu1 }
  0xdd   :  { %v325_v63 = vadd.f32 %v577_v52, %v324_v49  ;;  %v364_v2 = vmax.f32 %v330_v61, 0.0 }
  0xde   :  { %v685_v50 = vpop.f32.mrf.mxu1 }
  0xdf   :  { %v340_v56 = vadd.f32 %v685_v50, %v577_v52  ;;  %v363_v4 = vmax.f32 %v325_v63, 0.0 }
  0xe0   :  { %v334_v51 = vpop.f32.mrf.mxu1 }
  0xe1   :  { %v335_v59 = vadd.f32 %v577_v52, %v334_v51  ;;  %v366_v62 = vmax.f32 %v340_v56, 0.0 }
  0xe2   :  { %v688_v53 = vpop.f32.mrf.mxu1 }
  0xe3   :  { %v350_v54 = vadd.f32 %v688_v53, %v577_v52  ;;  %v365_v0 = vmax.f32 %v335_v59, 0.0 }
  0xe4   :  { %v344_v55 = vpop.f32.mrf.mxu1 }
  0xe5   :  { %v368_v57 = vmax.f32 %v350_v54, 0.0  ;;  %v345_v58 = vadd.f32 %v577_v52, %v344_v55 }
  0xe7   :  { %v367_v60 = vmax.f32 %v345_v58, 0.0  ;;  %689 = vmatprep.subr.mxu0 %v368_v57 }
  0xe8   :  { %690 = vmatpush3.msra.mxu0 %v368_v57 }
  0xe9   :  { %691 = vmatprep.subr.mxu0 %v367_v60 }
  0xea   :  { %692 = vmatpush3.msra.mxu0 %v367_v60 }
  0xeb   :  { %693 = vmatprep.subr.mxu0 %v366_v62 }
  0xec   :  { %694 = vmatpush3.msra.mxu0 %v366_v62 }
  0xed   :  { %695 = vmatprep.subr.mxu0 %v365_v0 }
  0xee   :  { %696 = vmatpush3.msra.mxu0 %v365_v0 }
  0xef   :  { %697 = vmatprep.subr.mxu0 %v364_v2 }
  0xf0   :  { %698 = vmatpush3.msra.mxu0 %v364_v2 }
  0xf1   :  { %699 = vmatprep.subr.mxu0 %v363_v4 }
  0xf2   :  { %700 = vmatpush3.msra.mxu0 %v363_v4 }
  0xf3   :  { %701 = vmatprep.subr.mxu0 %v362_v6 }
  0xf4   :  { %702 = vmatpush3.msra.mxu0 %v362_v6 }
  0xf5   :  { %703 = vmatprep.subr.mxu0 %v361_v8 }
  0xf6   :  { %704 = vmatpush3.msra.mxu0 %v361_v8 }
  0xf7   :  { %705 = vmatprep.subr.mxu0 %v360_v10 }
  0xf8   :  { %706 = vmatpush3.msra.mxu0 %v360_v10 }
  0xf9   :  { %707 = vmatprep.subr.mxu0 %v359_v12 }
  0xfa   :  { %708 = vmatpush3.msra.mxu0 %v359_v12 }
  0xfb   :  { %709 = vmatprep.subr.mxu0 %v358_v14 }
  0xfc   :  { %710 = vmatpush3.msra.mxu0 %v358_v14 }
  0xfd   :  { %711 = vmatprep.subr.mxu0 %v357_v16 }
  0xfe   :  { %712 = vmatpush3.msra.mxu0 %v357_v16 }
  0xff   :  { %713 = vmatprep.subr.mxu0 %v356_v18 }
 0x100   :  { %714 = vmatpush3.msra.mxu0 %v356_v18 }
 0x101   :  { %715 = vmatprep.subr.mxu0 %v355_v20 }
 0x102   :  { %716 = vmatpush3.msra.mxu0 %v355_v20 }
 0x103   :  { %717 = vmatprep.subr.mxu0 %v354_v22 }
 0x104   :  { %718 = vmatpush3.msra.mxu0 %v354_v22 }
 0x105   :  { %719 = vmatprep.subr.mxu0 %v353_v23 }
 0x106   :  { %720 = vmatpush3.msra.mxu0 %v353_v23 }
 0x107   :  { %722 = vmatmul.mubr.f32.vlgmr.msra.gmra.mxu0 %v598_v24 }
 0x1c7   :  { %v723_v28 = vpop.f32.mrf.mxu0 }
 0x1c9   :  { %v441_v29 = vpop.f32.mrf.mxu0 }
 0x1ca   :  { %756 = vmatprep.mubr.f32.mxu1 %v441_v29 }
 0x1cb   :  { %757 = vmatmul.mubr.f32.vlgmr.msra.gmra.mxu1 %v723_v28 }
 0x28b   :  { %v758_v31 = vpop.f32.mrf.mxu1 }
 0x28c   :  { %v553_v33 = vadd.f32 %v758_v31, %v125_v30 }
 0x28d   :  { %v543_v34 = vpop.f32.mrf.mxu1 }
 0x28e   :  { %v555_v35 = vmax.f32 %v553_v33, 0.0  ;;  %v552_v36 = vadd.f32 %v543_v34, %v120_v32 }
 0x290   :  { %557 = vst [vmem:[#allocation4 + $0x8] sm:$0xff] %v555_v35  ;;  %v554_v37 = vmax.f32 %v552_v36, 0.0 }
 0x292   :  { %556 = vst [vmem:[#allocation4] sm:$0xff] %v554_v37 }
 0x293   :  { %773 = shalt.err (!%p770_p4)
}
 0x294   :  { %s785_s7 = smov 128   ;;  %s786_s9 = smov 8  }
 0x295   :  { %569 = dma.vmem_to_hbm [thread:$0]  %s564_s30, 256, %s989_s8, [#allocation5], %s785_s7, %s785_s7, %s786_s9  }
 0x296   :  { %782 = dma.done.wait [#allocation5], 256  }
 0x297   :  { %783 = vsyncadd [#allocation5], 4294967040 }
 0x298   :  { %573 = vsyncpa [#allocation5], 1 }

</bundles_post_ra>
